<compile_context>
chip_gen: v7x
topology: tpu7x:2x2x1
jax: 0.10.0
libtpu: 0.0.40
codegen_flags: <defaults>
</compile_context>

<pallas_src>
import functools

import jax
import jax.numpy as jnp
from jax.experimental import pallas as pl
from jax.experimental.pallas import tpu as pltpu

NEG_SLOPE = 0.01  # F.leaky_relu default
LANE = 128


def _round_up(x, m):
    return (x + m - 1) // m * m


def _leaky_relu(x):
    # max(x, slope*x) is valid for 0 < slope < 1 and saves a compare/select.
    return jnp.maximum(x, NEG_SLOPE * x)


def _pick_tiles(n_pad):
    """Pick (TM, TK) tiles for the N_pad x N_pad adjacency (n_pad % 128 == 0)."""
    tm = 256 if n_pad % 256 == 0 else 128
    if n_pad % 512 == 0:
        tk = 512
    elif n_pad % 256 == 0:
        tk = 256
    else:
        tk = 128
    return tm, tk


# --------------------------------------------------------------------------
# Kernels
# --------------------------------------------------------------------------
def _conv1_kernel(a_ref, x_ref, w1_ref, b1_ref, h1_ref, acc_ref):
    """h1 = leaky_relu((A @ X) @ W1 + b1); reduction over grid axis 1."""
    k = pl.program_id(1)

    @pl.when(k == 0)
    def _init():
        acc_ref[...] = jnp.zeros_like(acc_ref)

    acc_ref[...] += jnp.dot(a_ref[...], x_ref[...],
                            preferred_element_type=jnp.float32)

    @pl.when(k == pl.num_programs(1) - 1)
    def _finalize():
        h = jnp.dot(acc_ref[...], w1_ref[...],
                    preferred_element_type=jnp.float32) + b1_ref[...]
        h1_ref[...] = _leaky_relu(h).astype(h1_ref.dtype)


def _conv2_linear_kernel(a_ref, h1_ref, w2_ref, b2_ref, w3t_ref, b3_ref,
                         out_ref, acc_ref):
    """out = leaky_relu(((A @ h1) @ W2 + b2) @ W3^T + b3); reduction over axis 1."""
    k = pl.program_id(1)

    @pl.when(k == 0)
    def _init():
        acc_ref[...] = jnp.zeros_like(acc_ref)

    acc_ref[...] += jnp.dot(a_ref[...], h1_ref[...],
                            preferred_element_type=jnp.float32)

    @pl.when(k == pl.num_programs(1) - 1)
    def _finalize():
        h2 = jnp.dot(acc_ref[...], w2_ref[...],
                     preferred_element_type=jnp.float32) + b2_ref[...]
        o = jnp.dot(h2, w3t_ref[...],
                    preferred_element_type=jnp.float32) + b3_ref[...]
        out_ref[...] = _leaky_relu(o).astype(out_ref.dtype)


# --------------------------------------------------------------------------
# Graph / parameter plumbing
# --------------------------------------------------------------------------
def build_dense_adjacency(edge_index, edge_weight, num_nodes):
    """Dense A[dst, src] = edge_weight, zero-padded to a tile-friendly size, bf16.

    Build this ONCE per graph and reuse it across forward calls (the N^2 scatter
    is the expensive part, not the layer itself).
    """
    n_pad = _round_up(max(num_nodes, LANE), LANE)
    if edge_weight is None:
        edge_weight = jnp.ones((edge_index.shape[1],), dtype=jnp.float32)
    src, dst = edge_index[0], edge_index[1]
    adj = jnp.zeros((n_pad, n_pad), jnp.float32).at[dst, src].add(edge_weight)
    return adj.astype(jnp.bfloat16)


@functools.partial(jax.jit, static_argnames=("num_nodes",))
def _forward_impl(x_node_features, adj_padded, params, num_nodes):
    n = num_nodes
    n_pad = adj_padded.shape[0]
    f_in, hidden = params["w1"].shape
    out_f = params["w2"].shape[1]

    f_pad = _round_up(f_in, LANE)
    h_pad = _round_up(hidden, LANE)
    o_pad = _round_up(out_f, LANE)

    tm, tk = _pick_tiles(n_pad)
    nm, nk = n_pad // tm, n_pad // tk

    # Zero-pad features / weights / biases to lane width (sliced off at the end).
    x_p = jnp.zeros((n_pad, f_pad), jnp.bfloat16).at[:n, :f_in].set(
        x_node_features.astype(jnp.bfloat16))
    w1_p = jnp.zeros((f_pad, h_pad), jnp.float32).at[:f_in, :hidden].set(params["w1"])
    b1_p = jnp.zeros((1, h_pad), jnp.float32).at[0, :hidden].set(params["b1"])
    w2_p = jnp.zeros((h_pad, o_pad), jnp.float32).at[:hidden, :out_f].set(params["w2"])
    b2_p = jnp.zeros((1, o_pad), jnp.float32).at[0, :out_f].set(params["b2"])
    w3t_p = jnp.zeros((o_pad, o_pad), jnp.float32).at[:out_f, :out_f].set(params["w3"].T)
    b3_p = jnp.zeros((1, o_pad), jnp.float32).at[0, :out_f].set(params["b3"])

    cparams = pltpu.CompilerParams(
        dimension_semantics=("parallel", "arbitrary"))

    # conv1 (+ leaky_relu; dropout == identity in eval mode)
    h1 = pl.pallas_call(
        _conv1_kernel,
        out_shape=jax.ShapeDtypeStruct((n_pad, h_pad), jnp.bfloat16),
        grid_spec=pltpu.PrefetchScalarGridSpec(
            num_scalar_prefetch=0,
            grid=(nm, nk),
            in_specs=[
                pl.BlockSpec((tm, tk), lambda i, k: (i, k)),        # A tile (bf16)
                pl.BlockSpec((tk, f_pad), lambda i, k: (k, 0)),     # X slab (bf16)
                pl.BlockSpec((f_pad, h_pad), lambda i, k: (0, 0)),  # W1
                pl.BlockSpec((1, h_pad), lambda i, k: (0, 0)),      # b1
            ],
            out_specs=pl.BlockSpec((tm, h_pad), lambda i, k: (i, 0)),
            scratch_shapes=[pltpu.VMEM((tm, f_pad), jnp.float32)],
        ),
        compiler_params=cparams,
    )(adj_padded, x_p, w1_p, b1_p)

    # conv2 + output transform linear (+ leaky_relu)
    out_p = pl.pallas_call(
        _conv2_linear_kernel,
        out_shape=jax.ShapeDtypeStruct((n_pad, o_pad), jnp.float32),
        grid_spec=pltpu.PrefetchScalarGridSpec(
            num_scalar_prefetch=0,
            grid=(nm, nk),
            in_specs=[
                pl.BlockSpec((tm, tk), lambda i, k: (i, k)),        # A tile (bf16)
                pl.BlockSpec((tk, h_pad), lambda i, k: (k, 0)),     # h1 slab (bf16)
                pl.BlockSpec((h_pad, o_pad), lambda i, k: (0, 0)),  # W2
                pl.BlockSpec((1, o_pad), lambda i, k: (0, 0)),      # b2
                pl.BlockSpec((o_pad, o_pad), lambda i, k: (0, 0)),  # W3^T
                pl.BlockSpec((1, o_pad), lambda i, k: (0, 0)),      # b3
            ],
            out_specs=pl.BlockSpec((tm, o_pad), lambda i, k: (i, 0)),
            scratch_shapes=[pltpu.VMEM((tm, h_pad), jnp.float32)],
        ),
        compiler_params=cparams,
    )(adj_padded, h1, w2_p, b2_p, w3t_p, b3_p)

    return out_p[:n, :out_f]


def knowledge_gcn_forward(x_node_features, adj_padded, params):
    """Forward pass. `adj_padded` is the bf16 [N_pad, N_pad] dense adjacency."""
    return _forward_impl(x_node_features, adj_padded, params,
                         num_nodes=x_node_features.shape[0])


def knowledge_gcn_layer(x_node_features, edge_index, edge_weight, params):
    """Convenience wrapper matching the original signature (rebuilds A per call)."""
    adj = build_dense_adjacency(edge_index, edge_weight, x_node_features.shape[0])
    return knowledge_gcn_forward(x_node_features, adj, params)


def init_params(key, in_features, hidden_features, out_features):
    k1, k2, k3, k4 = jax.random.split(key, 4)

    def glorot(k, shape):
        fan_in, fan_out = shape
        lim = (6.0 / (fan_in + fan_out)) ** 0.5
        return jax.random.uniform(k, shape, jnp.float32, -lim, lim)

    return {
        # GCNConv weights stored as [in, out] so conv is X @ W
        "w1": glorot(k1, (in_features, hidden_features)),
        "b1": jnp.zeros((hidden_features,), jnp.float32),
        "w2": glorot(k2, (hidden_features, out_features)),
        "b2": jnp.zeros((out_features,), jnp.float32),
        # nn.Linear weight is [out, out] (applied as x @ W^T)
        "w3": glorot(k3, (out_features, out_features)),
        "b3": jax.random.uniform(k4, (out_features,), jnp.float32, -0.1, 0.1),
    }


def _reference(x, adj_f32, params):
    """Pure-JAX f32 reference of the PyTorch forward (eval mode)."""
    def lrelu(v):
        return jnp.where(v > 0, v, NEG_SLOPE * v)
    h1 = lrelu(adj_f32 @ (x @ params["w1"]) + params["b1"])
    h2 = adj_f32 @ (h1 @ params["w2"]) + params["b2"]
    return lrelu(h2 @ params["w3"].T + params["b3"])


if __name__ == "__main__":
    key = jax.random.PRNGKey(0)
    k_feat, k_w, k_params = jax.random.split(key, 3)

    num_nodes = 16
    in_features, hidden_features, out_features = 8, 32, 16

    x = jax.random.normal(k_feat, (num_nodes, in_features), jnp.float32)

    # Deterministic ring graph (both directions), no self loops.
    src = jnp.arange(num_nodes, dtype=jnp.int32)
    dst = (src + 1) % num_nodes
    edge_index = jnp.concatenate(
        [jnp.stack([src, dst], axis=0), jnp.stack([dst, src], axis=0)], axis=1
    )  # [2, 2N]
    edge_weight = jax.random.uniform(k_w, (edge_index.shape[1],), jnp.float32, 0.1, 1.0)

    params = init_params(k_params, in_features, hidden_features, out_features)

    # Build the dense (padded, bf16) adjacency once per graph, then run the layer.
    adj = build_dense_adjacency(edge_index, edge_weight, num_nodes)
    out = knowledge_gcn_forward(x, adj, params)
    out = jax.block_until_ready(out)
    assert out.shape == (num_nodes, out_features)

    # Sanity check against the f32 reference (bf16 A/X/h1 => relaxed tolerance).
    adj_f32 = jnp.zeros((num_nodes, num_nodes), jnp.float32).at[
        edge_index[1], edge_index[0]].add(edge_weight)
    ref = _reference(x, adj_f32, params)
    max_err = float(jnp.max(jnp.abs(out - ref)))
    assert max_err < 0.2, f"max abs error vs reference too large: {max_err}"

    print("KERNEL_OK")
</pallas_src>

<mosaic_0001>
module attributes {stable_mosaic.version = 11 : i64} {
  func.func @_conv2_linear_kernel(%arg0: i32, %arg1: i32, %arg2: memref<128x128xbf16, #tpu.memory_space<vmem>>, %arg3: memref<128x128xbf16, #tpu.memory_space<vmem>>, %arg4: memref<128x128xf32, #tpu.memory_space<vmem>>, %arg5: memref<1x128xf32, #tpu.memory_space<vmem>>, %arg6: memref<128x128xf32, #tpu.memory_space<vmem>>, %arg7: memref<1x128xf32, #tpu.memory_space<vmem>>, %arg8: memref<128x128xf32, #tpu.memory_space<vmem>>, %arg9: memref<128x128xf32, #tpu.memory_space<vmem>>) attributes {dimension_semantics = [#tpu.dimension_semantics<parallel>, #tpu.dimension_semantics<arbitrary>], iteration_bounds = array<i64: 1, 1>, scalar_prefetch = 0 : i64, scratch_operands = 1 : i64, tpu.core_type = #tpu.core_type<tc>, window_params = [{transform_indices = @transform_0, window_bounds = array<i64: 128, 128>}, {transform_indices = @transform_1, window_bounds = array<i64: 128, 128>}, {pipeline_mode = #tpu.pipeline_mode<synchronous>, transform_indices = @transform_2, window_bounds = array<i64: 128, 128>}, {pipeline_mode = #tpu.pipeline_mode<synchronous>, transform_indices = @transform_3, window_bounds = array<i64: 1, 128>}, {pipeline_mode = #tpu.pipeline_mode<synchronous>, transform_indices = @transform_4, window_bounds = array<i64: 128, 128>}, {pipeline_mode = #tpu.pipeline_mode<synchronous>, transform_indices = @transform_5, window_bounds = array<i64: 1, 128>}, {transform_indices = @transform_6, window_bounds = array<i64: 128, 128>}]} {
    %c0_i32 = arith.constant 0 : i32
    %0 = arith.cmpi eq, %arg1, %c0_i32 : i32
    %1 = arith.extui %0 : i1 to i32
    %c0_i32_0 = arith.constant 0 : i32
    %2 = arith.cmpi ne, %1, %c0_i32_0 : i32
    scf.if %2 {
      %cst_10 = arith.constant 0.000000e+00 : f32
      %12 = vector.broadcast %cst_10 : f32 to vector<128x128xf32>
      %c0_11 = arith.constant 0 : index
      %c0_12 = arith.constant 0 : index
      %13 = vector.load %arg9[%c0_11, %c0_12] : memref<128x128xf32, #tpu.memory_space<vmem>>, vector<128x128xf32>
      tpu.vector_store %arg9[%c0_11, %c0_12], %12 {strides = array<i32>} : memref<128x128xf32, #tpu.memory_space<vmem>>, vector<128x128xf32>,
    } else {
    }
    %c0 = arith.constant 0 : index
    %c0_1 = arith.constant 0 : index
    %3 = vector.load %arg9[%c0, %c0_1] : memref<128x128xf32, #tpu.memory_space<vmem>>, vector<128x128xf32>
    %c0_2 = arith.constant 0 : index
    %c0_3 = arith.constant 0 : index
    %4 = vector.load %arg2[%c0_2, %c0_3] : memref<128x128xbf16, #tpu.memory_space<vmem>>, vector<128x128xbf16>
    %c0_4 = arith.constant 0 : index
    %c0_5 = arith.constant 0 : index
    %5 = vector.load %arg3[%c0_4, %c0_5] : memref<128x128xbf16, #tpu.memory_space<vmem>>, vector<128x128xbf16>
    %cst = arith.constant dense<0.000000e+00> : vector<128x128xf32>
    %6 = tpu.matmul %4, %5, %cst {dimension_numbers = #tpu.dot_dimension_numbers<[1], [0], [0], [1], [0, 0, 1, 1], [], []>} : vector<128x128xbf16>, vector<128x128xbf16>, vector<128x128xf32> -> vector<128x128xf32>
    %7 = arith.addf %3, %6 : vector<128x128xf32>
    %c0_6 = arith.constant 0 : index
    %c0_7 = arith.constant 0 : index
    %8 = vector.load %arg9[%c0_6, %c0_7] : memref<128x128xf32, #tpu.memory_space<vmem>>, vector<128x128xf32>
    tpu.vector_store %arg9[%c0_6, %c0_7], %7 {strides = array<i32>} : memref<128x128xf32, #tpu.memory_space<vmem>>, vector<128x128xf32>,
    %c0_i32_8 = arith.constant 0 : i32
    %9 = arith.cmpi eq, %arg1, %c0_i32_8 : i32
    %10 = arith.extui %9 : i1 to i32
    %c0_i32_9 = arith.constant 0 : i32
    %11 = arith.cmpi ne, %10, %c0_i32_9 : i32
    scf.if %11 {
      %c0_10 = arith.constant 0 : index
      %c0_11 = arith.constant 0 : index
      %12 = vector.load %arg9[%c0_10, %c0_11] : memref<128x128xf32, #tpu.memory_space<vmem>>, vector<128x128xf32>
      %c0_12 = arith.constant 0 : index
      %c0_13 = arith.constant 0 : index
      %13 = vector.load %arg4[%c0_12, %c0_13] : memref<128x128xf32, #tpu.memory_space<vmem>>, vector<128x128xf32>
      %cst_14 = arith.constant dense<0.000000e+00> : vector<128x128xf32>
      %14 = tpu.matmul %12, %13, %cst_14 {dimension_numbers = #tpu.dot_dimension_numbers<[1], [0], [0], [1], [0, 0, 1, 1], [], []>} : vector<128x128xf32>, vector<128x128xf32>, vector<128x128xf32> -> vector<128x128xf32>
      %c0_15 = arith.constant 0 : index
      %c0_16 = arith.constant 0 : index
      %15 = vector.load %arg5[%c0_15, %c0_16] : memref<1x128xf32, #tpu.memory_space<vmem>>, vector<1x128xf32>
      %16 = vector.broadcast %15 : vector<1x128xf32> to vector<128x128xf32>
      %17 = arith.addf %14, %16 : vector<128x128xf32>
      %c0_17 = arith.constant 0 : index
      %c0_18 = arith.constant 0 : index
      %18 = vector.load %arg6[%c0_17, %c0_18] : memref<128x128xf32, #tpu.memory_space<vmem>>, vector<128x128xf32>
      %cst_19 = arith.constant dense<0.000000e+00> : vector<128x128xf32>
      %19 = tpu.matmul %17, %18, %cst_19 {dimension_numbers = #tpu.dot_dimension_numbers<[1], [0], [0], [1], [0, 0, 1, 1], [], []>} : vector<128x128xf32>, vector<128x128xf32>, vector<128x128xf32> -> vector<128x128xf32>
      %c0_20 = arith.constant 0 : index
      %c0_21 = arith.constant 0 : index
      %20 = vector.load %arg7[%c0_20, %c0_21] : memref<1x128xf32, #tpu.memory_space<vmem>>, vector<1x128xf32>
      %21 = vector.broadcast %20 : vector<1x128xf32> to vector<128x128xf32>
      %22 = arith.addf %19, %21 : vector<128x128xf32>
      %cst_22 = arith.constant 0.00999999977 : f32
      %23 = vector.broadcast %cst_22 : f32 to vector<128x128xf32>
      %24 = arith.mulf %23, %22 : vector<128x128xf32>
      %25 = arith.maximumf %22, %24 : vector<128x128xf32>
      %c0_23 = arith.constant 0 : index
      %c0_24 = arith.constant 0 : index
      %26 = vector.load %arg8[%c0_23, %c0_24] : memref<128x128xf32, #tpu.memory_space<vmem>>, vector<128x128xf32>
      tpu.vector_store %arg8[%c0_23, %c0_24], %25 {strides = array<i32>} : memref<128x128xf32, #tpu.memory_space<vmem>>, vector<128x128xf32>,
    } else {
    }
    return
  }
  func.func @transform_0(%arg0: i32, %arg1: i32) -> (i32, i32) {
    %c0_i32 = arith.constant 0 : i32
    return %arg0, %arg1 : i32, i32
  }
  func.func @transform_1(%arg0: i32, %arg1: i32) -> (i32, i32) {
    %c0_i32 = arith.constant 0 : i32
    %c0_i32_0 = arith.constant 0 : i32
    return %arg1, %c0_i32 : i32, i32
  }
  func.func @transform_2(%arg0: i32, %arg1: i32) -> (i32, i32) {
    %c0_i32 = arith.constant 0 : i32
    %c0_i32_0 = arith.constant 0 : i32
    %c0_i32_1 = arith.constant 0 : i32
    return %c0_i32, %c0_i32_0 : i32, i32
  }
  func.func @transform_3(%arg0: i32, %arg1: i32) -> (i32, i32) {
    %c0_i32 = arith.constant 0 : i32
    %c0_i32_0 = arith.constant 0 : i32
    %c0_i32_1 = arith.constant 0 : i32
    return %c0_i32, %c0_i32_0 : i32, i32
  }
  func.func @transform_4(%arg0: i32, %arg1: i32) -> (i32, i32) {
    %c0_i32 = arith.constant 0 : i32
    %c0_i32_0 = arith.constant 0 : i32
    %c0_i32_1 = arith.constant 0 : i32
    return %c0_i32, %c0_i32_0 : i32, i32
  }
  func.func @transform_5(%arg0: i32, %arg1: i32) -> (i32, i32) {
    %c0_i32 = arith.constant 0 : i32
    %c0_i32_0 = arith.constant 0 : i32
    %c0_i32_1 = arith.constant 0 : i32
    return %c0_i32, %c0_i32_0 : i32, i32
  }
  func.func @transform_6(%arg0: i32, %arg1: i32) -> (i32, i32) {
    %c0_i32 = arith.constant 0 : i32
    %c0_i32_0 = arith.constant 0 : i32
    return %arg0, %c0_i32 : i32, i32
  }
}

module attributes {stable_mosaic.version = 11 : i64} {
  func.func @_conv1_kernel(%arg0: i32, %arg1: i32, %arg2: memref<128x128xbf16, #tpu.memory_space<vmem>>, %arg3: memref<128x128xbf16, #tpu.memory_space<vmem>>, %arg4: memref<128x128xf32, #tpu.memory_space<vmem>>, %arg5: memref<1x128xf32, #tpu.memory_space<vmem>>, %arg6: memref<128x128xbf16, #tpu.memory_space<vmem>>, %arg7: memref<128x128xf32, #tpu.memory_space<vmem>>) attributes {dimension_semantics = [#tpu.dimension_semantics<parallel>, #tpu.dimension_semantics<arbitrary>], iteration_bounds = array<i64: 1, 1>, scalar_prefetch = 0 : i64, scratch_operands = 1 : i64, tpu.core_type = #tpu.core_type<tc>, window_params = [{transform_indices = @transform_0, window_bounds = array<i64: 128, 128>}, {transform_indices = @transform_1, window_bounds = array<i64: 128, 128>}, {pipeline_mode = #tpu.pipeline_mode<synchronous>, transform_indices = @transform_2, window_bounds = array<i64: 128, 128>}, {pipeline_mode = #tpu.pipeline_mode<synchronous>, transform_indices = @transform_3, window_bounds = array<i64: 1, 128>}, {transform_indices = @transform_4, window_bounds = array<i64: 128, 128>}]} {
    %c0_i32 = arith.constant 0 : i32
    %0 = arith.cmpi eq, %arg1, %c0_i32 : i32
    %1 = arith.extui %0 : i1 to i32
    %c0_i32_0 = arith.constant 0 : i32
    %2 = arith.cmpi ne, %1, %c0_i32_0 : i32
    scf.if %2 {
      %cst_10 = arith.constant 0.000000e+00 : f32
      %12 = vector.broadcast %cst_10 : f32 to vector<128x128xf32>
      %c0_11 = arith.constant 0 : index
      %c0_12 = arith.constant 0 : index
      %13 = vector.load %arg7[%c0_11, %c0_12] : memref<128x128xf32, #tpu.memory_space<vmem>>, vector<128x128xf32>
      tpu.vector_store %arg7[%c0_11, %c0_12], %12 {strides = array<i32>} : memref<128x128xf32, #tpu.memory_space<vmem>>, vector<128x128xf32>,
    } else {
    }
    %c0 = arith.constant 0 : index
    %c0_1 = arith.constant 0 : index
    %3 = vector.load %arg7[%c0, %c0_1] : memref<128x128xf32, #tpu.memory_space<vmem>>, vector<128x128xf32>
    %c0_2 = arith.constant 0 : index
    %c0_3 = arith.constant 0 : index
    %4 = vector.load %arg2[%c0_2, %c0_3] : memref<128x128xbf16, #tpu.memory_space<vmem>>, vector<128x128xbf16>
    %c0_4 = arith.constant 0 : index
    %c0_5 = arith.constant 0 : index
    %5 = vector.load %arg3[%c0_4, %c0_5] : memref<128x128xbf16, #tpu.memory_space<vmem>>, vector<128x128xbf16>
    %cst = arith.constant dense<0.000000e+00> : vector<128x128xf32>
    %6 = tpu.matmul %4, %5, %cst {dimension_numbers = #tpu.dot_dimension_numbers<[1], [0], [0], [1], [0, 0, 1, 1], [], []>} : vector<128x128xbf16>, vector<128x128xbf16>, vector<128x128xf32> -> vector<128x128xf32>
    %7 = arith.addf %3, %6 : vector<128x128xf32>
    %c0_6 = arith.constant 0 : index
    %c0_7 = arith.constant 0 : index
    %8 = vector.load %arg7[%c0_6, %c0_7] : memref<128x128xf32, #tpu.memory_space<vmem>>, vector<128x128xf32>
    tpu.vector_store %arg7[%c0_6, %c0_7], %7 {strides = array<i32>} : memref<128x128xf32, #tpu.memory_space<vmem>>, vector<128x128xf32>,
    %c0_i32_8 = arith.constant 0 : i32
    %9 = arith.cmpi eq, %arg1, %c0_i32_8 : i32
    %10 = arith.extui %9 : i1 to i32
    %c0_i32_9 = arith.constant 0 : i32
    %11 = arith.cmpi ne, %10, %c0_i32_9 : i32
    scf.if %11 {
      %c0_10 = arith.constant 0 : index
      %c0_11 = arith.constant 0 : index
      %12 = vector.load %arg7[%c0_10, %c0_11] : memref<128x128xf32, #tpu.memory_space<vmem>>, vector<128x128xf32>
      %c0_12 = arith.constant 0 : index
      %c0_13 = arith.constant 0 : index
      %13 = vector.load %arg4[%c0_12, %c0_13] : memref<128x128xf32, #tpu.memory_space<vmem>>, vector<128x128xf32>
      %cst_14 = arith.constant dense<0.000000e+00> : vector<128x128xf32>
      %14 = tpu.matmul %12, %13, %cst_14 {dimension_numbers = #tpu.dot_dimension_numbers<[1], [0], [0], [1], [0, 0, 1, 1], [], []>} : vector<128x128xf32>, vector<128x128xf32>, vector<128x128xf32> -> vector<128x128xf32>
      %c0_15 = arith.constant 0 : index
      %c0_16 = arith.constant 0 : index
      %15 = vector.load %arg5[%c0_15, %c0_16] : memref<1x128xf32, #tpu.memory_space<vmem>>, vector<1x128xf32>
      %16 = vector.broadcast %15 : vector<1x128xf32> to vector<128x128xf32>
      %17 = arith.addf %14, %16 : vector<128x128xf32>
      %cst_17 = arith.constant 0.00999999977 : f32
      %18 = vector.broadcast %cst_17 : f32 to vector<128x128xf32>
      %19 = arith.mulf %18, %17 : vector<128x128xf32>
      %20 = arith.maximumf %17, %19 : vector<128x128xf32>
      %21 = arith.truncf %20 : vector<128x128xf32> to vector<128x128xbf16>
      %c0_18 = arith.constant 0 : index
      %c0_19 = arith.constant 0 : index
      %22 = vector.load %arg6[%c0_18, %c0_19] : memref<128x128xbf16, #tpu.memory_space<vmem>>, vector<128x128xbf16>
      tpu.vector_store %arg6[%c0_18, %c0_19], %21 {strides = array<i32>} : memref<128x128xbf16, #tpu.memory_space<vmem>>, vector<128x128xbf16>,
    } else {
    }
    return
  }
  func.func @transform_0(%arg0: i32, %arg1: i32) -> (i32, i32) {
    %c0_i32 = arith.constant 0 : i32
    return %arg0, %arg1 : i32, i32
  }
  func.func @transform_1(%arg0: i32, %arg1: i32) -> (i32, i32) {
    %c0_i32 = arith.constant 0 : i32
    %c0_i32_0 = arith.constant 0 : i32
    return %arg1, %c0_i32 : i32, i32
  }
  func.func @transform_2(%arg0: i32, %arg1: i32) -> (i32, i32) {
    %c0_i32 = arith.constant 0 : i32
    %c0_i32_0 = arith.constant 0 : i32
    %c0_i32_1 = arith.constant 0 : i32
    return %c0_i32, %c0_i32_0 : i32, i32
  }
  func.func @transform_3(%arg0: i32, %arg1: i32) -> (i32, i32) {
    %c0_i32 = arith.constant 0 : i32
    %c0_i32_0 = arith.constant 0 : i32
    %c0_i32_1 = arith.constant 0 : i32
    return %c0_i32, %c0_i32_0 : i32, i32
  }
  func.func @transform_4(%arg0: i32, %arg1: i32) -> (i32, i32) {
    %c0_i32 = arith.constant 0 : i32
    %c0_i32_0 = arith.constant 0 : i32
    return %arg0, %c0_i32 : i32, i32
  }
}

</mosaic_0001>

<bundles_post_ra>
// kernel: _forward_impl.2
= control target key start
LH: loop header
LB: loop body
LE: loop exit
PB: predicated region body
PF: predicated region fallthrough
CT: control target
= control target key end

     0   :  { %s1060_s1 = inlined_call_operand.vmem [shape: bf16[128,128], index: 1, kind: input, shape index: {}]   ;;  %s1061_s0 = inlined_call_operand.vmem [shape: bf16[128,128], index: 0, kind: input, shape index: {}]   ;;  %s1062_s2 = inlined_call_operand.vmem [shape: f32[128,128], index: 2, kind: input, shape index: {}]   ;;  %s1063_s3 = inlined_call_operand.vmem [shape: f32[1,128], index: 3, kind: input, shape index: {}]   ;;  %s1064_s4 = inlined_call_operand.vmem [shape: bf16[128,128], index: 4, kind: output, shape index: {}]  }
   0x1   :  { %v878_v0 = vld [vmem:[%s1060_s1] sm:$0xff]   ;;  %v879_v1 = vld [vmem:[%s1060_s1 + $0x8] sm:$0xff]   ;;  %v880_v2 = vld [vmem:[%s1060_s1 + $0x10] sm:$0xff]  }
   0x2   :  { %758 = vmatprep.subr.bf16.mxu0 %v878_v0  ;;  %v881_v3 = vld [vmem:[%s1060_s1 + $0x18] sm:$0xff]   ;;  %v886_v4 = vld [vmem:[%s1061_s0] sm:$0xff]   ;;  %v883_v6 = vld [vmem:[%s1060_s1 + $0x28] sm:$0xff]  }
   0x3   :  { %759 = vmatpush3.bf16.msra.mxu0 %v878_v0  ;;  %774 = vmatprep.mubr.bf16.mxu0 %v886_v4  ;;  %v882_v5 = vld [vmem:[%s1060_s1 + $0x20] sm:$0xff]   ;;  %v331_v8 = vld [vmem:[%s1062_s2 + $0x8] sm:$0xff]  ;;  %v332_v9 = vld [vmem:[%s1062_s2 + $0x10] sm:$0xff] }
   0x4   :  { %760 = vmatprep.subr.bf16.mxu0 %v879_v1  ;;  %v330_v7 = vld [vmem:[%s1062_s2] sm:$0xff]  ;;  %v333_v11 = vld [vmem:[%s1062_s2 + $0x18] sm:$0xff]  ;;  %v335_v14 = vld [vmem:[%s1062_s2 + $0x28] sm:$0xff] }
   0x5   :  { %v846_v10 = vpack.c.bf16 %v331_v8, %v330_v7  ;;  %v850_v12 = vpack.c.bf16 %v333_v11, %v332_v9  ;;  %v334_v13 = vld [vmem:[%s1062_s2 + $0x20] sm:$0xff]  ;;  %v884_v15 = vld [vmem:[%s1060_s1 + $0x30] sm:$0xff]   ;;  %v337_v18 = vld [vmem:[%s1062_s2 + $0x38] sm:$0xff] }
   0x6   :  { %v854_v16 = vpack.c.bf16 %v335_v14, %v334_v13  ;;  %v336_v17 = vld [vmem:[%s1062_s2 + $0x30] sm:$0xff]  ;;  %v885_v19 = vld [vmem:[%s1060_s1 + $0x38] sm:$0xff]   ;;  %v338_v21 = vld [vmem:[%s1062_s2 + $0x40] sm:$0xff] }
   0x7   :  { %761 = vmatpush3.bf16.msra.mxu0 %v879_v1  ;;  %847 = vmatprep.subr.bf16.mxu1 %v846_v10  ;;  %v858_v20 = vpack.c.bf16 %v337_v18, %v336_v17  ;;  %v339_v22 = vld [vmem:[%s1062_s2 + $0x48] sm:$0xff]  ;;  %v340_v25 = vld [vmem:[%s1062_s2 + $0x50] sm:$0xff]  ;;  %v341_v26 = vld [vmem:[%s1062_s2 + $0x58] sm:$0xff] }
   0x8   :  { %762 = vmatprep.subr.bf16.mxu0 %v880_v2  ;;  %849 = vmatpush3.bf16.msra.mxu1 %v846_v10  ;;  %v862_v23 = vpack.c.bf16 %v339_v22, %v338_v21  ;;  %v887_v24 = vld [vmem:[%s1061_s0 + $0x8] sm:$0xff]   ;;  %v888_v27 = vld [vmem:[%s1061_s0 + $0x10] sm:$0xff]   ;;  %v866_v28 = vpack.c.bf16 %v341_v26, %v340_v25  ;;  %v342_v29 = vld [vmem:[%s1062_s2 + $0x60] sm:$0xff] }
   0x9   :  { %851 = vmatprep.subr.bf16.mxu1 %v850_v12  ;;  %v343_v30 = vld [vmem:[%s1062_s2 + $0x68] sm:$0xff]  ;;  %v889_v32 = vld [vmem:[%s1061_s0 + $0x18] sm:$0xff]   ;;  %v890_v33 = vld [vmem:[%s1061_s0 + $0x20] sm:$0xff]  }
   0xa   :  { %v870_v31 = vpack.c.bf16 %v343_v30, %v342_v29  ;;  %v891_v34 = vld [vmem:[%s1061_s0 + $0x28] sm:$0xff]   ;;  %v892_v35 = vld [vmem:[%s1061_s0 + $0x30] sm:$0xff]   ;;  %v893_v36 = vld [vmem:[%s1061_s0 + $0x38] sm:$0xff]  }
   0xb   :  { %763 = vmatpush3.bf16.msra.mxu0 %v880_v2  ;;  %v344_v37 = vld [vmem:[%s1062_s2 + $0x70] sm:$0xff]  ;;  %v345_v38 = vld [vmem:[%s1062_s2 + $0x78] sm:$0xff]  ;;  %v1018_v56 = vld [vmem:[%s1063_s3] ss:$0 sm:$0xff] }
   0xc   :  { %764 = vmatprep.subr.bf16.mxu0 %v881_v3  ;;  %853 = vmatpush3.bf16.msra.mxu1 %v850_v12  ;;  %v874_v39 = vpack.c.bf16 %v345_v38, %v344_v37 }
   0xd   :  { %855 = vmatprep.subr.bf16.mxu1 %v854_v16 }
   0xf   :  { %765 = vmatpush3.bf16.msra.mxu0 %v881_v3 }
  0x10   :  { %766 = vmatprep.subr.bf16.mxu0 %v882_v5  ;;  %857 = vmatpush3.bf16.msra.mxu1 %v854_v16 }
  0x11   :  { %859 = vmatprep.subr.bf16.mxu1 %v858_v20 }
  0x13   :  { %767 = vmatpush3.bf16.msra.mxu0 %v882_v5 }
  0x14   :  { %768 = vmatprep.subr.bf16.mxu0 %v883_v6  ;;  %861 = vmatpush3.bf16.msra.mxu1 %v858_v20 }
  0x15   :  { %863 = vmatprep.subr.bf16.mxu1 %v862_v23 }
  0x17   :  { %769 = vmatpush3.bf16.msra.mxu0 %v883_v6 }
  0x18   :  { %770 = vmatprep.subr.bf16.mxu0 %v884_v15  ;;  %865 = vmatpush3.bf16.msra.mxu1 %v862_v23 }
  0x19   :  { %867 = vmatprep.subr.bf16.mxu1 %v866_v28 }
  0x1b   :  { %771 = vmatpush3.bf16.msra.mxu0 %v884_v15 }
  0x1c   :  { %772 = vmatprep.subr.bf16.mxu0 %v885_v19  ;;  %869 = vmatpush3.bf16.msra.mxu1 %v866_v28 }
  0x1d   :  { %871 = vmatprep.subr.bf16.mxu1 %v870_v31 }
  0x1f   :  { %773 = vmatpush3.bf16.msra.mxu0 %v885_v19 }
  0x20   :  { %873 = vmatpush3.bf16.msra.mxu1 %v870_v31 }
  0x21   :  { %875 = vmatprep.subr.bf16.mxu1 %v874_v39 }
  0x22   :  { %775 = vmatmul.mubr.bf16.vlgmr.msra.gmra.mrb[0].mxu0 %v887_v24 }
  0x23   :  { %778 = vmatprep.mubr.bf16.mxu0 %v888_v27 }
  0x24   :  { %877 = vmatpush3.bf16.msra.mxu1 %v874_v39 }
  0x2a   :  { %779 = vmatmul.mubr.bf16.gmra.mrb[4].mxu0 %v889_v32 }
  0x2b   :  { %782 = vmatprep.mubr.bf16.mxu0 %v890_v33 }
  0x32   :  { %783 = vmatmul.mubr.bf16.gmra.mrb[8].mxu0 %v891_v34 }
  0x33   :  { %786 = vmatprep.mubr.bf16.mxu0 %v892_v35 }
  0x3a   :  { %787 = vmatmul.mubr.bf16.gmra.mrb[12].mxu0 %v893_v36 }
  0xf5   :  { %v776_v40 = vpop.f32.mrb[0].mxu0 }
  0xf6   :  { %v216_v41 = vpop.f32.mrb[1].mxu0 }
  0xf7   :  { %v777_v42 = vpop.f32.mrb[2].mxu0  ;;  %822 = vmatprep.mubr.f32.mxu1 %v216_v41 }
  0xf8   :  { %v219_v43 = vpop.f32.mrb[3].mxu0 }
  0xf9   :  { %823 = vmatmul.mubr.f32.vlgmr.msra.gmra.mrb[0].mxu1 %v219_v43 }
  0xfa   :  { %825 = vmatprep.mubr.f32.mxu1 %v776_v40 }
  0xfd   :  { %v780_v44 = vpop.f32.mrb[4].mxu0  ;;  %826 = vmatmul.mubr.f32.gmra.mrb[2].mxu1 %v777_v42 }
  0xfe   :  { %v232_v45 = vpop.f32.mrb[5].mxu0 }
  0xff   :  { %v781_v46 = vpop.f32.mrb[6].mxu0  ;;  %828 = vmatprep.mubr.f32.mxu1 %v232_v45 }
 0x100   :  { %v235_v47 = vpop.f32.mrb[7].mxu0 }
 0x101   :  { %829 = vmatmul.mubr.f32.gmra.mrb[4].mxu1 %v235_v47 }
 0x102   :  { %831 = vmatprep.mubr.f32.mxu1 %v780_v44 }
 0x105   :  { %v784_v48 = vpop.f32.mrb[8].mxu0  ;;  %832 = vmatmul.mubr.f32.gmra.mrb[6].mxu1 %v781_v46 }
 0x106   :  { %v248_v49 = vpop.f32.mrb[9].mxu0 }
 0x107   :  { %v785_v50 = vpop.f32.mrb[10].mxu0  ;;  %834 = vmatprep.mubr.f32.mxu1 %v248_v49 }
 0x108   :  { %v251_v51 = vpop.f32.mrb[11].mxu0 }
 0x109   :  { %835 = vmatmul.mubr.f32.gmra.mrb[8].mxu1 %v251_v51 }
 0x10a   :  { %837 = vmatprep.mubr.f32.mxu1 %v784_v48 }
 0x10d   :  { %v788_v52 = vpop.f32.mrb[12].mxu0  ;;  %838 = vmatmul.mubr.f32.gmra.mrb[10].mxu1 %v785_v50 }
 0x10e   :  { %v264_v53 = vpop.f32.mrb[13].mxu0 }
 0x10f   :  { %v789_v54 = vpop.f32.mrb[14].mxu0  ;;  %840 = vmatprep.mubr.f32.mxu1 %v264_v53 }
 0x110   :  { %v267_v55 = vpop.f32.mrb[15].mxu0 }
 0x111   :  { %841 = vmatmul.mubr.f32.gmra.mrb[12].mxu1 %v267_v55 }
 0x112   :  { %843 = vmatprep.mubr.f32.mxu1 %v788_v52 }
 0x115   :  { %844 = vmatmul.mubr.f32.gmra.mrb[14].mxu1 %v789_v54 }
 0x1cc   :  { %v824_v57 = vpop.f32.mrb[0].mxu1 }
 0x1cd   :  { %v425_v58 = vadd.f32 %v824_v57, %v1018_v56  ;;  %v419_v59 = vpop.f32.mrb[1].mxu1 }
 0x1ce   :  { %v420_v60 = vadd.f32 %v1018_v56, %v419_v59 }
 0x1cf   :  { %v499_v61 = vmul.f32 0.01, %v425_v58 }
 0x1d0   :  { %v498_v62 = vmul.f32 0.01, %v420_v60  ;;  %v827_v63 = vpop.f32.mrb[2].mxu1 }
 0x1d1   :  { %v515_v0 = vmax.f32 %v425_v58, %v499_v61  ;;  %v435_v1 = vadd.f32 %v827_v63, %v1018_v56  ;;  %v429_v2 = vpop.f32.mrb[3].mxu1 }
 0x1d2   :  { %v514_v3 = vmax.f32 %v420_v60, %v498_v62  ;;  %v430_v4 = vadd.f32 %v1018_v56, %v429_v2 }
 0x1d3   :  { %v501_v5 = vmul.f32 0.01, %v435_v1 }
 0x1d4   :  { %v666_v6 = vpack.c.bf16 %v515_v0, %v514_v3  ;;  %v500_v7 = vmul.f32 0.01, %v430_v4  ;;  %v830_v8 = vpop.f32.mrb[4].mxu1 }
 0x1d5   :  { %v517_v9 = vmax.f32 %v435_v1, %v501_v5  ;;  %v445_v10 = vadd.f32 %v830_v8, %v1018_v56  ;;  %v439_v11 = vpop.f32.mrb[5].mxu1 }
 0x1d6   :  { %667 = vst [vmem:[%s1064_s4] sm:$0xff] %v666_v6   ;;  %v516_v12 = vmax.f32 %v430_v4, %v500_v7  ;;  %v440_v13 = vadd.f32 %v1018_v56, %v439_v11 }
 0x1d7   :  { %v503_v14 = vmul.f32 0.01, %v445_v10 }
 0x1d8   :  { %v671_v15 = vpack.c.bf16 %v517_v9, %v516_v12  ;;  %v502_v16 = vmul.f32 0.01, %v440_v13  ;;  %v833_v17 = vpop.f32.mrb[6].mxu1 }
 0x1d9   :  { %v519_v18 = vmax.f32 %v445_v10, %v503_v14  ;;  %v455_v19 = vadd.f32 %v833_v17, %v1018_v56  ;;  %v449_v20 = vpop.f32.mrb[7].mxu1 }
 0x1da   :  { %703 = vst [vmem:[%s1064_s4 + $0x8] sm:$0xff] %v671_v15   ;;  %v518_v21 = vmax.f32 %v440_v13, %v502_v16  ;;  %v450_v22 = vadd.f32 %v1018_v56, %v449_v20 }
 0x1db   :  { %v505_v23 = vmul.f32 0.01, %v455_v19 }
 0x1dc   :  { %v676_v24 = vpack.c.bf16 %v519_v18, %v518_v21  ;;  %v504_v25 = vmul.f32 0.01, %v450_v22  ;;  %v836_v26 = vpop.f32.mrb[8].mxu1 }
 0x1dd   :  { %v521_v27 = vmax.f32 %v455_v19, %v505_v23  ;;  %v465_v28 = vadd.f32 %v836_v26, %v1018_v56  ;;  %v459_v29 = vpop.f32.mrb[9].mxu1 }
 0x1de   :  { %704 = vst [vmem:[%s1064_s4 + $0x10] sm:$0xff] %v676_v24   ;;  %v520_v30 = vmax.f32 %v450_v22, %v504_v25  ;;  %v460_v31 = vadd.f32 %v1018_v56, %v459_v29 }
 0x1df   :  { %v507_v32 = vmul.f32 0.01, %v465_v28 }
 0x1e0   :  { %v681_v33 = vpack.c.bf16 %v521_v27, %v520_v30  ;;  %v506_v34 = vmul.f32 0.01, %v460_v31  ;;  %v839_v35 = vpop.f32.mrb[10].mxu1 }
 0x1e1   :  { %v523_v36 = vmax.f32 %v465_v28, %v507_v32  ;;  %v475_v37 = vadd.f32 %v839_v35, %v1018_v56  ;;  %v469_v38 = vpop.f32.mrb[11].mxu1 }
 0x1e2   :  { %705 = vst [vmem:[%s1064_s4 + $0x18] sm:$0xff] %v681_v33   ;;  %v522_v39 = vmax.f32 %v460_v31, %v506_v34  ;;  %v470_v40 = vadd.f32 %v1018_v56, %v469_v38 }
 0x1e3   :  { %v509_v41 = vmul.f32 0.01, %v475_v37 }
 0x1e4   :  { %v686_v42 = vpack.c.bf16 %v523_v36, %v522_v39  ;;  %v508_v43 = vmul.f32 0.01, %v470_v40  ;;  %v842_v44 = vpop.f32.mrb[12].mxu1 }
 0x1e5   :  { %v525_v45 = vmax.f32 %v475_v37, %v509_v41  ;;  %v485_v46 = vadd.f32 %v842_v44, %v1018_v56  ;;  %v479_v47 = vpop.f32.mrb[13].mxu1 }
 0x1e6   :  { %706 = vst [vmem:[%s1064_s4 + $0x20] sm:$0xff] %v686_v42   ;;  %v524_v48 = vmax.f32 %v470_v40, %v508_v43  ;;  %v480_v49 = vadd.f32 %v1018_v56, %v479_v47 }
 0x1e7   :  { %v511_v50 = vmul.f32 0.01, %v485_v46 }
 0x1e8   :  { %v691_v51 = vpack.c.bf16 %v525_v45, %v524_v48  ;;  %v510_v52 = vmul.f32 0.01, %v480_v49  ;;  %v845_v53 = vpop.f32.mrb[14].mxu1 }
 0x1e9   :  { %v527_v54 = vmax.f32 %v485_v46, %v511_v50  ;;  %v495_v55 = vadd.f32 %v845_v53, %v1018_v56  ;;  %v489_v57 = vpop.f32.mrb[15].mxu1 }
 0x1ea   :  { %707 = vst [vmem:[%s1064_s4 + $0x28] sm:$0xff] %v691_v51   ;;  %v526_v58 = vmax.f32 %v480_v49, %v510_v52  ;;  %v490_v59 = vadd.f32 %v1018_v56, %v489_v57 }
 0x1eb   :  { %v513_v60 = vmul.f32 0.01, %v495_v55 }
 0x1ec   :  { %v696_v61 = vpack.c.bf16 %v527_v54, %v526_v58  ;;  %v512_v62 = vmul.f32 0.01, %v490_v59 }
 0x1ed   :  { %v529_v63 = vmax.f32 %v495_v55, %v513_v60 }
 0x1ee   :  { %708 = vst [vmem:[%s1064_s4 + $0x30] sm:$0xff] %v696_v61   ;;  %v528_v0 = vmax.f32 %v490_v59, %v512_v62 }
 0x1f0   :  { %v701_v1 = vpack.c.bf16 %v529_v63, %v528_v0 }
 0x1f2   :  { %709 = vst [vmem:[%s1064_s4 + $0x38] sm:$0xff] %v701_v1  }

// kernel: _forward_impl.3
= control target key start
LH: loop header
LB: loop body
LE: loop exit
PB: predicated region body
PF: predicated region fallthrough
CT: control target
= control target key end

     0   :  { %s1313_s1 = inlined_call_operand.vmem [shape: bf16[128,128], index: 1, kind: input, shape index: {}]   ;;  %s1314_s0 = inlined_call_operand.vmem [shape: bf16[128,128], index: 0, kind: input, shape index: {}]   ;;  %s1315_s2 = inlined_call_operand.vmem [shape: f32[128,128], index: 2, kind: input, shape index: {}]   ;;  %s1316_s4 = inlined_call_operand.vmem [shape: f32[128,128], index: 4, kind: input, shape index: {}]   ;;  %s1317_s3 = inlined_call_operand.vmem [shape: f32[1,128], index: 3, kind: input, shape index: {}]   ;;  %s1318_s5 = inlined_call_operand.vmem [shape: f32[1,128], index: 5, kind: input, shape index: {}]   ;;  %s1319_s6 = inlined_call_operand.vmem [shape: f32[128,128], index: 6, kind: output, shape index: {}]  }
   0x1   :  { %v1046_v0 = vld [vmem:[%s1313_s1] sm:$0xff]   ;;  %v1047_v1 = vld [vmem:[%s1313_s1 + $0x8] sm:$0xff]   ;;  %v1048_v2 = vld [vmem:[%s1313_s1 + $0x10] sm:$0xff]  }
   0x2   :  { %822 = vmatprep.subr.bf16.mxu0 %v1046_v0  ;;  %v1049_v3 = vld [vmem:[%s1313_s1 + $0x18] sm:$0xff]   ;;  %v1054_v4 = vld [vmem:[%s1314_s0] sm:$0xff]   ;;  %v1051_v6 = vld [vmem:[%s1313_s1 + $0x28] sm:$0xff]  }
   0x3   :  { %823 = vmatpush3.bf16.msra.mxu0 %v1046_v0  ;;  %838 = vmatprep.mubr.bf16.mxu0 %v1054_v4  ;;  %v1050_v5 = vld [vmem:[%s1313_s1 + $0x20] sm:$0xff]   ;;  %v337_v8 = vld [vmem:[%s1315_s2 + $0x8] sm:$0xff]  ;;  %v338_v9 = vld [vmem:[%s1315_s2 + $0x10] sm:$0xff] }
   0x4   :  { %824 = vmatprep.subr.bf16.mxu0 %v1047_v1  ;;  %v336_v7 = vld [vmem:[%s1315_s2] sm:$0xff]  ;;  %v339_v11 = vld [vmem:[%s1315_s2 + $0x18] sm:$0xff]  ;;  %v341_v14 = vld [vmem:[%s1315_s2 + $0x28] sm:$0xff] }
   0x5   :  { %v966_v10 = vpack.c.bf16 %v337_v8, %v336_v7  ;;  %v970_v12 = vpack.c.bf16 %v339_v11, %v338_v9  ;;  %v340_v13 = vld [vmem:[%s1315_s2 + $0x20] sm:$0xff]  ;;  %v1052_v15 = vld [vmem:[%s1313_s1 + $0x30] sm:$0xff]   ;;  %v343_v18 = vld [vmem:[%s1315_s2 + $0x38] sm:$0xff] }
   0x6   :  { %v974_v16 = vpack.c.bf16 %v341_v14, %v340_v13  ;;  %v342_v17 = vld [vmem:[%s1315_s2 + $0x30] sm:$0xff]  ;;  %v1053_v19 = vld [vmem:[%s1313_s1 + $0x38] sm:$0xff]   ;;  %v344_v21 = vld [vmem:[%s1315_s2 + $0x40] sm:$0xff] }
   0x7   :  { %825 = vmatpush3.bf16.msra.mxu0 %v1047_v1  ;;  %967 = vmatprep.subr.bf16.mxu1 %v966_v10  ;;  %v978_v20 = vpack.c.bf16 %v343_v18, %v342_v17  ;;  %v345_v22 = vld [vmem:[%s1315_s2 + $0x48] sm:$0xff]  ;;  %v346_v25 = vld [vmem:[%s1315_s2 + $0x50] sm:$0xff]  ;;  %v347_v26 = vld [vmem:[%s1315_s2 + $0x58] sm:$0xff] }
   0x8   :  { %826 = vmatprep.subr.bf16.mxu0 %v1048_v2  ;;  %969 = vmatpush3.bf16.msra.mxu1 %v966_v10  ;;  %v982_v23 = vpack.c.bf16 %v345_v22, %v344_v21  ;;  %v1055_v24 = vld [vmem:[%s1314_s0 + $0x8] sm:$0xff]   ;;  %v1056_v27 = vld [vmem:[%s1314_s0 + $0x10] sm:$0xff]   ;;  %v986_v28 = vpack.c.bf16 %v347_v26, %v346_v25  ;;  %v348_v29 = vld [vmem:[%s1315_s2 + $0x60] sm:$0xff] }
   0x9   :  { %971 = vmatprep.subr.bf16.mxu1 %v970_v12  ;;  %v349_v30 = vld [vmem:[%s1315_s2 + $0x68] sm:$0xff]  ;;  %v1057_v32 = vld [vmem:[%s1314_s0 + $0x18] sm:$0xff]   ;;  %v1058_v33 = vld [vmem:[%s1314_s0 + $0x20] sm:$0xff]  }
   0xa   :  { %v990_v31 = vpack.c.bf16 %v349_v30, %v348_v29  ;;  %v1059_v34 = vld [vmem:[%s1314_s0 + $0x28] sm:$0xff]   ;;  %v1060_v35 = vld [vmem:[%s1314_s0 + $0x30] sm:$0xff]   ;;  %v1061_v36 = vld [vmem:[%s1314_s0 + $0x38] sm:$0xff]  }
   0xb   :  { %827 = vmatpush3.bf16.msra.mxu0 %v1048_v2  ;;  %v350_v37 = vld [vmem:[%s1315_s2 + $0x70] sm:$0xff]  ;;  %v351_v38 = vld [vmem:[%s1315_s2 + $0x78] sm:$0xff]  ;;  %v504_v40 = vld [vmem:[%s1316_s4] sm:$0xff] }
   0xc   :  { %828 = vmatprep.subr.bf16.mxu0 %v1049_v3  ;;  %973 = vmatpush3.bf16.msra.mxu1 %v970_v12  ;;  %v994_v39 = vpack.c.bf16 %v351_v38, %v350_v37  ;;  %v505_v41 = vld [vmem:[%s1316_s4 + $0x8] sm:$0xff]  ;;  %v506_v42 = vld [vmem:[%s1316_s4 + $0x10] sm:$0xff]  ;;  %v507_v44 = vld [vmem:[%s1316_s4 + $0x18] sm:$0xff] }
   0xd   :  { %975 = vmatprep.subr.bf16.mxu1 %v974_v16  ;;  %v998_v43 = vpack.c.bf16 %v505_v41, %v504_v40  ;;  %v1002_v45 = vpack.c.bf16 %v507_v44, %v506_v42  ;;  %v508_v46 = vld [vmem:[%s1316_s4 + $0x20] sm:$0xff]  ;;  %v509_v47 = vld [vmem:[%s1316_s4 + $0x28] sm:$0xff]  ;;  %v510_v49 = vld [vmem:[%s1316_s4 + $0x30] sm:$0xff] }
   0xe   :  { %v1006_v48 = vpack.c.bf16 %v509_v47, %v508_v46  ;;  %v511_v50 = vld [vmem:[%s1316_s4 + $0x38] sm:$0xff]  ;;  %v512_v52 = vld [vmem:[%s1316_s4 + $0x40] sm:$0xff]  ;;  %v513_v53 = vld [vmem:[%s1316_s4 + $0x48] sm:$0xff] }
   0xf   :  { %829 = vmatpush3.bf16.msra.mxu0 %v1049_v3  ;;  %v1010_v51 = vpack.c.bf16 %v511_v50, %v510_v49  ;;  %v1014_v54 = vpack.c.bf16 %v513_v53, %v512_v52  ;;  %v514_v55 = vld [vmem:[%s1316_s4 + $0x50] sm:$0xff]  ;;  %v515_v56 = vld [vmem:[%s1316_s4 + $0x58] sm:$0xff]  ;;  %v516_v58 = vld [vmem:[%s1316_s4 + $0x60] sm:$0xff] }
  0x10   :  { %830 = vmatprep.subr.bf16.mxu0 %v1050_v5  ;;  %977 = vmatpush3.bf16.msra.mxu1 %v974_v16  ;;  %v1018_v57 = vpack.c.bf16 %v515_v56, %v514_v55  ;;  %v517_v59 = vld [vmem:[%s1316_s4 + $0x68] sm:$0xff]  ;;  %v518_v13 = vld [vmem:[%s1316_s4 + $0x70] sm:$0xff]  ;;  %v519_v14 = vld [vmem:[%s1316_s4 + $0x78] sm:$0xff] }
  0x11   :  { %979 = vmatprep.subr.bf16.mxu1 %v978_v20  ;;  %v1022_v60 = vpack.c.bf16 %v517_v59, %v516_v58  ;;  %v740_v16 = vld [vmem:[%s1317_s3] ss:$0 sm:$0xff] }
  0x12   :  { %v1247_v49 = vld [vmem:[%s1318_s5] ss:$0 sm:$0xff] }
  0x13   :  { %831 = vmatpush3.bf16.msra.mxu0 %v1050_v5 }
  0x14   :  { %832 = vmatprep.subr.bf16.mxu0 %v1051_v6  ;;  %981 = vmatpush3.bf16.msra.mxu1 %v978_v20 }
  0x15   :  { %983 = vmatprep.subr.bf16.mxu1 %v982_v23 }
  0x17   :  { %833 = vmatpush3.bf16.msra.mxu0 %v1051_v6 }
  0x18   :  { %834 = vmatprep.subr.bf16.mxu0 %v1052_v15  ;;  %985 = vmatpush3.bf16.msra.mxu1 %v982_v23 }
  0x19   :  { %987 = vmatprep.subr.bf16.mxu1 %v986_v28 }
  0x1b   :  { %835 = vmatpush3.bf16.msra.mxu0 %v1052_v15  ;;  %v1026_v15 = vpack.c.bf16 %v519_v14, %v518_v13 }
  0x1c   :  { %836 = vmatprep.subr.bf16.mxu0 %v1053_v19  ;;  %989 = vmatpush3.bf16.msra.mxu1 %v986_v28 }
  0x1d   :  { %991 = vmatprep.subr.bf16.mxu1 %v990_v31 }
  0x1f   :  { %837 = vmatpush3.bf16.msra.mxu0 %v1053_v19 }
  0x20   :  { %993 = vmatpush3.bf16.msra.mxu1 %v990_v31  ;;  %999 = vmatprep.subr.bf16.mxu0 %v998_v43 }
  0x21   :  { %995 = vmatprep.subr.bf16.mxu1 %v994_v39 }
  0x22   :  { %839 = vmatmul.mubr.bf16.vlgmr.msra.gmra.mrb[0].mxu0 %v1055_v24 }
  0x23   :  { %842 = vmatprep.mubr.bf16.mxu0 %v1056_v27  ;;  %1001 = vmatpush3.bf16.msra.mxu0 %v998_v43 }
  0x24   :  { %997 = vmatpush3.bf16.msra.mxu1 %v994_v39  ;;  %1003 = vmatprep.subr.bf16.mxu0 %v1002_v45 }
  0x25   :  { %1030 = vmatprep.subr.bf16.mxu1 %v998_v43 }
  0x27   :  { %1005 = vmatpush3.bf16.msra.mxu0 %v1002_v45 }
  0x28   :  { %1007 = vmatprep.subr.bf16.mxu0 %v1006_v48 }
  0x2a   :  { %843 = vmatmul.mubr.bf16.gmra.mrb[4].mxu0 %v1057_v32 }
  0x2b   :  { %846 = vmatprep.mubr.bf16.mxu0 %v1058_v33  ;;  %1009 = vmatpush3.bf16.msra.mxu0 %v1006_v48 }
  0x2c   :  { %1011 = vmatprep.subr.bf16.mxu0 %v1010_v51 }
  0x2f   :  { %1013 = vmatpush3.bf16.msra.mxu0 %v1010_v51 }
  0x30   :  { %1015 = vmatprep.subr.bf16.mxu0 %v1014_v54 }
  0x32   :  { %847 = vmatmul.mubr.bf16.gmra.mrb[8].mxu0 %v1059_v34 }
  0x33   :  { %850 = vmatprep.mubr.bf16.mxu0 %v1060_v35  ;;  %1017 = vmatpush3.bf16.msra.mxu0 %v1014_v54 }
  0x34   :  { %1019 = vmatprep.subr.bf16.mxu0 %v1018_v57 }
  0x37   :  { %1021 = vmatpush3.bf16.msra.mxu0 %v1018_v57 }
  0x38   :  { %1023 = vmatprep.subr.bf16.mxu0 %v1022_v60 }
  0x3a   :  { %851 = vmatmul.mubr.bf16.gmra.mrb[12].mxu0 %v1061_v36 }
  0x3b   :  { %1025 = vmatpush3.bf16.msra.mxu0 %v1022_v60 }
  0x3c   :  { %1027 = vmatprep.subr.bf16.mxu0 %v1026_v15 }
  0x3f   :  { %1029 = vmatpush3.bf16.msra.mxu0 %v1026_v15 }
  0xf5   :  { %v840_v61 = vpop.f32.mrb[0].mxu0 }
  0xf6   :  { %v222_v62 = vpop.f32.mrb[1].mxu0 }
  0xf7   :  { %v841_v63 = vpop.f32.mrb[2].mxu0  ;;  %886 = vmatprep.mubr.f32.mxu1 %v222_v62 }
  0xf8   :  { %v225_v0 = vpop.f32.mrb[3].mxu0 }
  0xf9   :  { %887 = vmatmul.mubr.f32.vlgmr.msra.gmra.mrb[0].mxu1 %v225_v0 }
  0xfa   :  { %889 = vmatprep.mubr.f32.mxu1 %v840_v61  ;;  %1038 = vmatpush3.bf16.msra.mxu1 %v998_v43 }
  0xfb   :  { %1031 = vmatprep.subr.bf16.mxu1 %v1002_v45 }
  0xfd   :  { %v844_v1 = vpop.f32.mrb[4].mxu0  ;;  %890 = vmatmul.mubr.f32.gmra.mrb[2].mxu1 %v841_v63 }
  0xfe   :  { %v238_v2 = vpop.f32.mrb[5].mxu0  ;;  %1039 = vmatpush3.bf16.msra.mxu1 %v1002_v45 }
  0xff   :  { %v845_v3 = vpop.f32.mrb[6].mxu0  ;;  %892 = vmatprep.mubr.f32.mxu1 %v238_v2  ;;  %1032 = vmatprep.subr.bf16.mxu1 %v1006_v48 }
 0x100   :  { %v241_v4 = vpop.f32.mrb[7].mxu0 }
 0x101   :  { %893 = vmatmul.mubr.f32.gmra.mrb[4].mxu1 %v241_v4 }
 0x102   :  { %895 = vmatprep.mubr.f32.mxu1 %v844_v1  ;;  %1040 = vmatpush3.bf16.msra.mxu1 %v1006_v48 }
 0x103   :  { %1033 = vmatprep.subr.bf16.mxu1 %v1010_v51 }
 0x105   :  { %v848_v5 = vpop.f32.mrb[8].mxu0  ;;  %896 = vmatmul.mubr.f32.gmra.mrb[6].mxu1 %v845_v3 }
 0x106   :  { %v254_v6 = vpop.f32.mrb[9].mxu0  ;;  %1041 = vmatpush3.bf16.msra.mxu1 %v1010_v51 }
 0x107   :  { %v849_v7 = vpop.f32.mrb[10].mxu0  ;;  %898 = vmatprep.mubr.f32.mxu1 %v254_v6  ;;  %1034 = vmatprep.subr.bf16.mxu1 %v1014_v54 }
 0x108   :  { %v257_v8 = vpop.f32.mrb[11].mxu0 }
 0x109   :  { %899 = vmatmul.mubr.f32.gmra.mrb[8].mxu1 %v257_v8 }
 0x10a   :  { %901 = vmatprep.mubr.f32.mxu1 %v848_v5  ;;  %1042 = vmatpush3.bf16.msra.mxu1 %v1014_v54 }
 0x10b   :  { %1035 = vmatprep.subr.bf16.mxu1 %v1018_v57 }
 0x10d   :  { %v852_v9 = vpop.f32.mrb[12].mxu0  ;;  %902 = vmatmul.mubr.f32.gmra.mrb[10].mxu1 %v849_v7 }
 0x10e   :  { %v270_v10 = vpop.f32.mrb[13].mxu0  ;;  %1043 = vmatpush3.bf16.msra.mxu1 %v1018_v57 }
 0x10f   :  { %v853_v11 = vpop.f32.mrb[14].mxu0  ;;  %904 = vmatprep.mubr.f32.mxu1 %v270_v10  ;;  %1036 = vmatprep.subr.bf16.mxu1 %v1022_v60 }
 0x110   :  { %v273_v12 = vpop.f32.mrb[15].mxu0 }
 0x111   :  { %905 = vmatmul.mubr.f32.gmra.mrb[12].mxu1 %v273_v12 }
 0x112   :  { %907 = vmatprep.mubr.f32.mxu1 %v852_v9  ;;  %1044 = vmatpush3.bf16.msra.mxu1 %v1022_v60 }
 0x113   :  { %1037 = vmatprep.subr.bf16.mxu1 %v1026_v15 }
 0x115   :  { %908 = vmatmul.mubr.f32.gmra.mrb[14].mxu1 %v853_v11 }
 0x116   :  { %1045 = vmatpush3.bf16.msra.mxu1 %v1026_v15 }
 0x1cc   :  { %v888_v17 = vpop.f32.mrb[0].mxu1 }
 0x1cd   :  { %v425_v18 = vpop.f32.mrb[1].mxu1  ;;  %v431_v20 = vadd.f32 %v888_v17, %v740_v16 }
 0x1ce   :  { %v426_v19 = vadd.f32 %v740_v16, %v425_v18 }
 0x1d0   :  { %v891_v21 = vpop.f32.mrb[2].mxu1  ;;  %942 = vmatprep.mubr.f32.mxu0 %v426_v19 }
 0x1d1   :  { %v435_v22 = vpop.f32.mrb[3].mxu1  ;;  %943 = vmatmul.mubr.f32.vlgmr.msra.gmra.mrb[16].mxu0 %v431_v20  ;;  %v441_v24 = vadd.f32 %v891_v21, %v740_v16 }
 0x1d2   :  { %v436_v23 = vadd.f32 %v740_v16, %v435_v22 }
 0x1d4   :  { %v894_v25 = vpop.f32.mrb[4].mxu1  ;;  %945 = vmatprep.mubr.f32.mxu0 %v436_v23 }
 0x1d5   :  { %v445_v26 = vpop.f32.mrb[5].mxu1  ;;  %946 = vmatmul.mubr.f32.gmra.mrb[18].mxu0 %v441_v24  ;;  %v451_v28 = vadd.f32 %v894_v25, %v740_v16 }
 0x1d6   :  { %v446_v27 = vadd.f32 %v740_v16, %v445_v26 }
 0x1d8   :  { %v897_v29 = vpop.f32.mrb[6].mxu1  ;;  %948 = vmatprep.mubr.f32.mxu0 %v446_v27 }
 0x1d9   :  { %v455_v30 = vpop.f32.mrb[7].mxu1  ;;  %949 = vmatmul.mubr.f32.gmra.mrb[20].mxu0 %v451_v28  ;;  %v461_v32 = vadd.f32 %v897_v29, %v740_v16 }
 0x1da   :  { %v456_v31 = vadd.f32 %v740_v16, %v455_v30 }
 0x1dc   :  { %v900_v33 = vpop.f32.mrb[8].mxu1  ;;  %951 = vmatprep.mubr.f32.mxu0 %v456_v31 }
 0x1dd   :  { %v465_v34 = vpop.f32.mrb[9].mxu1  ;;  %952 = vmatmul.mubr.f32.gmra.mrb[22].mxu0 %v461_v32  ;;  %v471_v36 = vadd.f32 %v900_v33, %v740_v16 }
 0x1de   :  { %v466_v35 = vadd.f32 %v740_v16, %v465_v34 }
 0x1e0   :  { %v903_v37 = vpop.f32.mrb[10].mxu1  ;;  %954 = vmatprep.mubr.f32.mxu1 %v466_v35 }
 0x1e1   :  { %v475_v38 = vpop.f32.mrb[11].mxu1  ;;  %955 = vmatmul.mubr.f32.vlgmr.msra.gmra.mrb[16].mxu1 %v471_v36  ;;  %v481_v40 = vadd.f32 %v903_v37, %v740_v16 }
 0x1e2   :  { %v476_v39 = vadd.f32 %v740_v16, %v475_v38 }
 0x1e4   :  { %v906_v41 = vpop.f32.mrb[12].mxu1  ;;  %957 = vmatprep.mubr.f32.mxu1 %v476_v39 }
 0x1e5   :  { %v485_v42 = vpop.f32.mrb[13].mxu1  ;;  %958 = vmatmul.mubr.f32.gmra.mrb[18].mxu1 %v481_v40  ;;  %v491_v44 = vadd.f32 %v906_v41, %v740_v16 }
 0x1e6   :  { %v486_v43 = vadd.f32 %v740_v16, %v485_v42 }
 0x1e8   :  { %v909_v45 = vpop.f32.mrb[14].mxu1  ;;  %960 = vmatprep.mubr.f32.mxu1 %v486_v43 }
 0x1e9   :  { %v495_v46 = vpop.f32.mrb[15].mxu1  ;;  %961 = vmatmul.mubr.f32.gmra.mrb[20].mxu1 %v491_v44  ;;  %v501_v48 = vadd.f32 %v909_v45, %v740_v16 }
 0x1ea   :  { %v496_v47 = vadd.f32 %v740_v16, %v495_v46 }
 0x1ec   :  { %963 = vmatprep.mubr.f32.mxu1 %v496_v47 }
 0x1ed   :  { %964 = vmatmul.mubr.f32.gmra.mrb[22].mxu1 %v501_v48 }
 0x2a4   :  { %v944_v50 = vpop.f32.mrb[16].mxu0 }
 0x2a5   :  { %v599_v51 = vadd.f32 %v944_v50, %v1247_v49  ;;  %v593_v52 = vpop.f32.mrb[17].mxu0 }
 0x2a6   :  { %v594_v53 = vadd.f32 %v1247_v49, %v593_v52 }
 0x2a7   :  { %v673_v54 = vmul.f32 0.01, %v599_v51 }
 0x2a8   :  { %v672_v55 = vmul.f32 0.01, %v594_v53  ;;  %v947_v56 = vpop.f32.mrb[18].mxu0 }
 0x2a9   :  { %v689_v57 = vmax.f32 %v599_v51, %v673_v54  ;;  %v609_v58 = vadd.f32 %v947_v56, %v1247_v49  ;;  %v603_v59 = vpop.f32.mrb[19].mxu0 }
 0x2aa   :  { %v688_v60 = vmax.f32 %v594_v53, %v672_v55  ;;  %v604_v61 = vadd.f32 %v1247_v49, %v603_v59 }
 0x2ab   :  { %705 = vst [vmem:[%s1319_s6 + $0x8] sm:$0xff] %v689_v57  ;;  %v675_v62 = vmul.f32 0.01, %v609_v58 }
 0x2ac   :  { %704 = vst [vmem:[%s1319_s6] sm:$0xff] %v688_v60  ;;  %v674_v63 = vmul.f32 0.01, %v604_v61  ;;  %v950_v0 = vpop.f32.mrb[20].mxu0 }
 0x2ad   :  { %v691_v1 = vmax.f32 %v609_v58, %v675_v62  ;;  %v619_v2 = vadd.f32 %v950_v0, %v1247_v49  ;;  %v613_v3 = vpop.f32.mrb[21].mxu0 }
 0x2ae   :  { %v690_v4 = vmax.f32 %v604_v61, %v674_v63  ;;  %v614_v5 = vadd.f32 %v1247_v49, %v613_v3 }
 0x2af   :  { %707 = vst [vmem:[%s1319_s6 + $0x18] sm:$0xff] %v691_v1  ;;  %v677_v6 = vmul.f32 0.01, %v619_v2 }
 0x2b0   :  { %706 = vst [vmem:[%s1319_s6 + $0x10] sm:$0xff] %v690_v4  ;;  %v676_v7 = vmul.f32 0.01, %v614_v5  ;;  %v953_v8 = vpop.f32.mrb[22].mxu0 }
 0x2b1   :  { %v693_v9 = vmax.f32 %v619_v2, %v677_v6  ;;  %v629_v10 = vadd.f32 %v953_v8, %v1247_v49  ;;  %v623_v11 = vpop.f32.mrb[23].mxu0 }
 0x2b2   :  { %v692_v12 = vmax.f32 %v614_v5, %v676_v7  ;;  %v624_v13 = vadd.f32 %v1247_v49, %v623_v11 }
 0x2b3   :  { %709 = vst [vmem:[%s1319_s6 + $0x28] sm:$0xff] %v693_v9  ;;  %v679_v14 = vmul.f32 0.01, %v629_v10 }
 0x2b4   :  { %708 = vst [vmem:[%s1319_s6 + $0x20] sm:$0xff] %v692_v12  ;;  %v678_v15 = vmul.f32 0.01, %v624_v13  ;;  %v956_v16 = vpop.f32.mrb[16].mxu1 }
 0x2b5   :  { %v695_v17 = vmax.f32 %v629_v10, %v679_v14  ;;  %v639_v18 = vadd.f32 %v956_v16, %v1247_v49  ;;  %v633_v19 = vpop.f32.mrb[17].mxu1 }
 0x2b6   :  { %v694_v20 = vmax.f32 %v624_v13, %v678_v15  ;;  %v634_v21 = vadd.f32 %v1247_v49, %v633_v19 }
 0x2b7   :  { %711 = vst [vmem:[%s1319_s6 + $0x38] sm:$0xff] %v695_v17  ;;  %v681_v22 = vmul.f32 0.01, %v639_v18 }
 0x2b8   :  { %710 = vst [vmem:[%s1319_s6 + $0x30] sm:$0xff] %v694_v20  ;;  %v680_v23 = vmul.f32 0.01, %v634_v21  ;;  %v959_v24 = vpop.f32.mrb[18].mxu1 }
 0x2b9   :  { %v697_v25 = vmax.f32 %v639_v18, %v681_v22  ;;  %v649_v26 = vadd.f32 %v959_v24, %v1247_v49  ;;  %v643_v27 = vpop.f32.mrb[19].mxu1 }
 0x2ba   :  { %v696_v28 = vmax.f32 %v634_v21, %v680_v23  ;;  %v644_v29 = vadd.f32 %v1247_v49, %v643_v27 }
 0x2bb   :  { %713 = vst [vmem:[%s1319_s6 + $0x48] sm:$0xff] %v697_v25  ;;  %v683_v30 = vmul.f32 0.01, %v649_v26 }
 0x2bc   :  { %712 = vst [vmem:[%s1319_s6 + $0x40] sm:$0xff] %v696_v28  ;;  %v682_v31 = vmul.f32 0.01, %v644_v29  ;;  %v962_v32 = vpop.f32.mrb[20].mxu1 }
 0x2bd   :  { %v699_v33 = vmax.f32 %v649_v26, %v683_v30  ;;  %v659_v34 = vadd.f32 %v962_v32, %v1247_v49  ;;  %v653_v35 = vpop.f32.mrb[21].mxu1 }
 0x2be   :  { %v698_v36 = vmax.f32 %v644_v29, %v682_v31  ;;  %v654_v37 = vadd.f32 %v1247_v49, %v653_v35 }
 0x2bf   :  { %715 = vst [vmem:[%s1319_s6 + $0x58] sm:$0xff] %v699_v33  ;;  %v685_v38 = vmul.f32 0.01, %v659_v34 }
 0x2c0   :  { %714 = vst [vmem:[%s1319_s6 + $0x50] sm:$0xff] %v698_v36  ;;  %v684_v39 = vmul.f32 0.01, %v654_v37  ;;  %v965_v40 = vpop.f32.mrb[22].mxu1 }
 0x2c1   :  { %v701_v41 = vmax.f32 %v659_v34, %v685_v38  ;;  %v669_v42 = vadd.f32 %v965_v40, %v1247_v49  ;;  %v663_v43 = vpop.f32.mrb[23].mxu1 }
 0x2c2   :  { %v700_v44 = vmax.f32 %v654_v37, %v684_v39  ;;  %v664_v45 = vadd.f32 %v1247_v49, %v663_v43 }
 0x2c3   :  { %717 = vst [vmem:[%s1319_s6 + $0x68] sm:$0xff] %v701_v41  ;;  %v687_v46 = vmul.f32 0.01, %v669_v42 }
 0x2c4   :  { %716 = vst [vmem:[%s1319_s6 + $0x60] sm:$0xff] %v700_v44  ;;  %v686_v47 = vmul.f32 0.01, %v664_v45 }
 0x2c5   :  { %v703_v48 = vmax.f32 %v669_v42, %v687_v46 }
 0x2c6   :  { %v702_v50 = vmax.f32 %v664_v45, %v686_v47 }
 0x2c7   :  { %719 = vst [vmem:[%s1319_s6 + $0x78] sm:$0xff] %v703_v48 }
 0x2c8   :  { %718 = vst [vmem:[%s1319_s6 + $0x70] sm:$0xff] %v702_v50 }

</bundles_post_ra>
